<compile_context>
chip_gen: v6e
topology: v6e:2x2x1
jax: 0.10.0
libtpu: 0.0.40
codegen_flags: <defaults>
</compile_context>

<pallas_src>
import functools

import jax
import jax.numpy as jnp
from jax import lax
from jax.experimental import pallas as pl
from jax.experimental.pallas import tpu as pltpu


def _round_up(x, m):
    return (x + m - 1) // m * m


def _cdm_kernel(sid_ref, iid_ref, qT_ref, studT_ref, itemT_ref,
                w1a_ref, w1b_ref, b1_ref, w2_ref, b2_ref, out_ref):
    """One batch tile. Layout: batch on lanes, features on sublanes."""
    ns = studT_ref.shape[1]
    ni = itemT_ref.shape[1]
    tb = out_ref.shape[1]

    sid = sid_ref[...]                                   # [1, TB] int32
    iid = iid_ref[...]                                   # [1, TB] int32

    # In-kernel embedding gather: one-hot matmul against VMEM-resident tables.
    onehot_s = (lax.broadcasted_iota(jnp.int32, (ns, tb), 0) == sid
                ).astype(jnp.float32)                    # [NS, TB]
    onehot_i = (lax.broadcasted_iota(jnp.int32, (ni, tb), 0) == iid
                ).astype(jnp.float32)                    # [NI, TB]
    sa = jnp.dot(studT_ref[...], onehot_s,
                 preferred_element_type=jnp.float32)     # [S, TB]
    idf = jnp.dot(itemT_ref[...], onehot_i,
                  preferred_element_type=jnp.float32)    # [S, TB]

    q = qT_ref[...].astype(jnp.float32)                  # [S, TB] (bf16 storage)
    ma = sa * q                                          # masked abilities
    md = idf * q                                         # masked difficulties

    # fc1:  (concat([ma, md], K) @ W1.T).T  ==  W1a @ ma_T + W1b @ md_T  (exact)
    h = (jnp.dot(w1a_ref[...], ma, preferred_element_type=jnp.float32)
         + jnp.dot(w1b_ref[...], md, preferred_element_type=jnp.float32)
         + b1_ref[...])                                  # [H, TB]
    h = jnp.maximum(h, 0.0)                              # relu

    # fc2 + sigmoid, lane-dense [1, TB] output slab.
    logits = jnp.dot(w2_ref[...], h,
                     preferred_element_type=jnp.float32) + b2_ref[...]
    out_ref[...] = jax.nn.sigmoid(logits)


def prepare_params(params):
    """One-time (hoisted) weight preprocessing for the transposed kernel."""
    S = params["student_emb"].shape[1]
    H = params["w1"].shape[0]
    return {
        "stud_T": params["student_emb"].T.astype(jnp.float32),   # [S, NS]
        "item_T": params["item_emb"].T.astype(jnp.float32),      # [S, NI]
        "w1a": params["w1"][:, :S].astype(jnp.float32),          # [H, S]
        "w1b": params["w1"][:, S:].astype(jnp.float32),          # [H, S]
        "b1": params["b1"].reshape(H, 1).astype(jnp.float32),    # [H, 1]
        "w2": params["w2"].astype(jnp.float32),                  # [1, H]
        "b2": params["b2"].reshape(1, 1).astype(jnp.float32),    # [1, 1]
    }


@functools.partial(jax.jit, static_argnames=("block_b",))
def neural_cdm_forward(student_ids, item_ids, q_matrix, prep, block_b=512):
    S, NS = prep["stud_T"].shape
    _, NI = prep["item_T"].shape
    H = prep["w1a"].shape[0]
    B = q_matrix.shape[0]

    # Batch lives on lanes -> pad B to a multiple of the (128-aligned) tile.
    # block_b sized well under the 32 MiB scoped VMEM default (re-derive for
    # v7x's 64 MiB/TC if tiles are ever made much larger).
    tb = min(block_b, _round_up(B, 128))
    b_pad = _round_up(B, tb)
    grid = b_pad // tb

    sid = jnp.zeros((1, b_pad), jnp.int32).at[0, :B].set(
        student_ids.astype(jnp.int32))
    iid = jnp.zeros((1, b_pad), jnp.int32).at[0, :B].set(
        item_ids.astype(jnp.int32))
    q_T = jnp.zeros((S, b_pad), jnp.bfloat16).at[:, :B].set(
        q_matrix.astype(jnp.bfloat16).T)

    in_specs = [
        pl.BlockSpec((1, tb), lambda i: (0, i)),      # student ids (streamed)
        pl.BlockSpec((1, tb), lambda i: (0, i)),      # item ids    (streamed)
        pl.BlockSpec((S, tb), lambda i: (0, i)),      # q^T         (streamed)
        pl.BlockSpec((S, NS), lambda i: (0, 0)),      # student table (resident)
        pl.BlockSpec((S, NI), lambda i: (0, 0)),      # item table    (resident)
        pl.BlockSpec((H, S), lambda i: (0, 0)),       # w1a           (resident)
        pl.BlockSpec((H, S), lambda i: (0, 0)),       # w1b           (resident)
        pl.BlockSpec((H, 1), lambda i: (0, 0)),       # b1            (resident)
        pl.BlockSpec((1, H), lambda i: (0, 0)),       # w2            (resident)
        pl.BlockSpec((1, 1), lambda i: (0, 0)),       # b2            (resident)
    ]
    out_spec = pl.BlockSpec((1, tb), lambda i: (0, i))

    flops = b_pad * (2 * S * NS + 2 * S * NI + 2 * (2 * S) * H + 2 * H)
    weight_bytes = 4 * (prep["stud_T"].size + prep["item_T"].size
                        + prep["w1a"].size + prep["w1b"].size
                        + prep["b1"].size + prep["w2"].size + prep["b2"].size)
    bytes_accessed = (sid.size * 4 + iid.size * 4 + q_T.size * 2
                      + weight_bytes + b_pad * 4)

    out = pl.pallas_call(
        _cdm_kernel,
        out_shape=jax.ShapeDtypeStruct((1, b_pad), jnp.float32),
        grid=(grid,),
        in_specs=in_specs,
        out_specs=out_spec,
        compiler_params=pltpu.CompilerParams(
            dimension_semantics=("parallel",)),
        cost_estimate=pl.CostEstimate(
            flops=flops, transcendentals=b_pad, bytes_accessed=bytes_accessed),
    )(sid, iid, q_T, prep["stud_T"], prep["item_T"],
      prep["w1a"], prep["w1b"], prep["b1"], prep["w2"], prep["b2"])

    return out[0, :B]   # squeeze(-1) equivalent


def _xavier_uniform(key, shape):
    fan_out, fan_in = shape
    bound = (6.0 / (fan_in + fan_out)) ** 0.5
    return jax.random.uniform(key, shape, jnp.float32, -bound, bound)


def init_params(key, num_skills, num_students, num_items, hidden_dim):
    k = jax.random.split(key, 6)
    # PyTorch Linear default bias init: U(-1/sqrt(fan_in), 1/sqrt(fan_in))
    b1_bound = 1.0 / (num_skills * 2) ** 0.5
    b2_bound = 1.0 / hidden_dim ** 0.5
    return {
        "student_emb": _xavier_uniform(k[0], (num_students, num_skills)),
        "item_emb": _xavier_uniform(k[1], (num_items, num_skills)),
        "w1": _xavier_uniform(k[2], (hidden_dim, num_skills * 2)),
        "b1": jax.random.uniform(k[3], (hidden_dim,), jnp.float32,
                                 -b1_bound, b1_bound),
        "w2": _xavier_uniform(k[4], (1, hidden_dim)),
        "b2": jax.random.uniform(k[5], (1,), jnp.float32, -b2_bound, b2_bound),
    }


def reference_forward(student_ids, item_ids, q_matrix, params):
    sa = jnp.take(params["student_emb"], student_ids, axis=0)
    idf = jnp.take(params["item_emb"], item_ids, axis=0)
    combined = jnp.concatenate([sa * q_matrix, idf * q_matrix], axis=1)
    h = jnp.maximum(combined @ params["w1"].T + params["b1"], 0.0)
    return jax.nn.sigmoid(h @ params["w2"].T + params["b2"])[:, 0]


if __name__ == "__main__":
    num_skills, num_students, num_items, hidden_dim = 16, 32, 24, 64
    batch = 8

    key = jax.random.PRNGKey(0)
    kp, ks, ki, kq = jax.random.split(key, 4)
    params = init_params(kp, num_skills, num_students, num_items, hidden_dim)
    prep = prepare_params(params)   # hoisted, one-time weight preprocessing

    student_ids = jax.random.randint(ks, (batch,), 0, num_students)
    item_ids = jax.random.randint(ki, (batch,), 0, num_items)
    q_matrix = jax.random.bernoulli(kq, 0.5, (batch, num_skills)).astype(jnp.float32)

    out = neural_cdm_forward(student_ids, item_ids, q_matrix, prep)
    out = jax.block_until_ready(out)

    ref = reference_forward(student_ids, item_ids, q_matrix, params)
    assert out.shape == (batch,)
    assert jnp.allclose(out, ref, atol=1e-5), (out, ref)
    print("KERNEL_OK")
</pallas_src>

<mosaic_0001>
module attributes {stable_mosaic.version = 11 : i64} {
  func.func @_cdm_kernel(%arg0: i32, %arg1: memref<1x128xi32, #tpu.memory_space<vmem>>, %arg2: memref<1x128xi32, #tpu.memory_space<vmem>>, %arg3: memref<16x128xbf16, #tpu.memory_space<vmem>>, %arg4: memref<16x32xf32, #tpu.memory_space<vmem>>, %arg5: memref<16x24xf32, #tpu.memory_space<vmem>>, %arg6: memref<64x16xf32, #tpu.memory_space<vmem>>, %arg7: memref<64x16xf32, #tpu.memory_space<vmem>>, %arg8: memref<64x1xf32, #tpu.memory_space<vmem>>, %arg9: memref<1x64xf32, #tpu.memory_space<vmem>>, %arg10: memref<1x1xf32, #tpu.memory_space<vmem>>, %arg11: memref<1x128xf32, #tpu.memory_space<vmem>>) attributes {dimension_semantics = [#tpu.dimension_semantics<parallel>], iteration_bounds = array<i64: 1>, scalar_prefetch = 0 : i64, scratch_operands = 0 : i64, tpu.core_type = #tpu.core_type<tc>, window_params = [{transform_indices = @transform_0, window_bounds = array<i64: 1, 128>}, {transform_indices = @transform_1, window_bounds = array<i64: 1, 128>}, {transform_indices = @transform_2, window_bounds = array<i64: 16, 128>}, {pipeline_mode = #tpu.pipeline_mode<synchronous>, transform_indices = @transform_3, window_bounds = array<i64: 16, 32>}, {pipeline_mode = #tpu.pipeline_mode<synchronous>, transform_indices = @transform_4, window_bounds = array<i64: 16, 24>}, {pipeline_mode = #tpu.pipeline_mode<synchronous>, transform_indices = @transform_5, window_bounds = array<i64: 64, 16>}, {pipeline_mode = #tpu.pipeline_mode<synchronous>, transform_indices = @transform_6, window_bounds = array<i64: 64, 16>}, {pipeline_mode = #tpu.pipeline_mode<synchronous>, transform_indices = @transform_7, window_bounds = array<i64: 64, 1>}, {pipeline_mode = #tpu.pipeline_mode<synchronous>, transform_indices = @transform_8, window_bounds = array<i64: 1, 64>}, {pipeline_mode = #tpu.pipeline_mode<synchronous>, transform_indices = @transform_9, window_bounds = array<i64: 1, 1>}, {transform_indices = @transform_10, window_bounds = array<i64: 1, 128>}]} {
    %c0 = arith.constant 0 : index
    %c0_0 = arith.constant 0 : index
    %0 = vector.load %arg1[%c0, %c0_0] : memref<1x128xi32, #tpu.memory_space<vmem>>, vector<1x128xi32>
    %c0_1 = arith.constant 0 : index
    %c0_2 = arith.constant 0 : index
    %1 = vector.load %arg2[%c0_1, %c0_2] : memref<1x128xi32, #tpu.memory_space<vmem>>, vector<1x128xi32>
    %2 = tpu.iota {dimensions = array<i32: 0>} : vector<32x128xi32>
    %3 = vector.broadcast %0 : vector<1x128xi32> to vector<32x128xi32>
    %4 = arith.cmpi eq, %2, %3 : vector<32x128xi32>
    %5 = arith.extui %4 : vector<32x128xi1> to vector<32x128xi32>
    %6 = arith.sitofp %5 : vector<32x128xi32> to vector<32x128xf32>
    %7 = tpu.iota {dimensions = array<i32: 0>} : vector<24x128xi32>
    %8 = vector.broadcast %1 : vector<1x128xi32> to vector<24x128xi32>
    %9 = arith.cmpi eq, %7, %8 : vector<24x128xi32>
    %10 = arith.extui %9 : vector<24x128xi1> to vector<24x128xi32>
    %11 = arith.sitofp %10 : vector<24x128xi32> to vector<24x128xf32>
    %c0_3 = arith.constant 0 : index
    %c0_4 = arith.constant 0 : index
    %12 = vector.load %arg4[%c0_3, %c0_4] : memref<16x32xf32, #tpu.memory_space<vmem>>, vector<16x32xf32>
    %cst = arith.constant dense<0.000000e+00> : vector<16x128xf32>
    %13 = tpu.matmul %12, %6, %cst {dimension_numbers = #tpu.dot_dimension_numbers<[1], [0], [0], [1], [0, 0, 1, 1], [], []>} : vector<16x32xf32>, vector<32x128xf32>, vector<16x128xf32> -> vector<16x128xf32>
    %c0_5 = arith.constant 0 : index
    %c0_6 = arith.constant 0 : index
    %14 = vector.load %arg5[%c0_5, %c0_6] : memref<16x24xf32, #tpu.memory_space<vmem>>, vector<16x24xf32>
    %cst_7 = arith.constant dense<0.000000e+00> : vector<16x128xf32>
    %15 = tpu.matmul %14, %11, %cst_7 {dimension_numbers = #tpu.dot_dimension_numbers<[1], [0], [0], [1], [0, 0, 1, 1], [], []>} : vector<16x24xf32>, vector<24x128xf32>, vector<16x128xf32> -> vector<16x128xf32>
    %c0_8 = arith.constant 0 : index
    %c0_9 = arith.constant 0 : index
    %16 = vector.load %arg3[%c0_8, %c0_9] : memref<16x128xbf16, #tpu.memory_space<vmem>>, vector<16x128xbf16>
    %17 = arith.extf %16 : vector<16x128xbf16> to vector<16x128xf32>
    %18 = arith.mulf %13, %17 : vector<16x128xf32>
    %19 = arith.mulf %15, %17 : vector<16x128xf32>
    %c0_10 = arith.constant 0 : index
    %c0_11 = arith.constant 0 : index
    %20 = vector.load %arg6[%c0_10, %c0_11] : memref<64x16xf32, #tpu.memory_space<vmem>>, vector<64x16xf32>
    %cst_12 = arith.constant dense<0.000000e+00> : vector<64x128xf32>
    %21 = tpu.matmul %20, %18, %cst_12 {dimension_numbers = #tpu.dot_dimension_numbers<[1], [0], [0], [1], [0, 0, 1, 1], [], []>} : vector<64x16xf32>, vector<16x128xf32>, vector<64x128xf32> -> vector<64x128xf32>
    %c0_13 = arith.constant 0 : index
    %c0_14 = arith.constant 0 : index
    %22 = vector.load %arg7[%c0_13, %c0_14] : memref<64x16xf32, #tpu.memory_space<vmem>>, vector<64x16xf32>
    %cst_15 = arith.constant dense<0.000000e+00> : vector<64x128xf32>
    %23 = tpu.matmul %22, %19, %cst_15 {dimension_numbers = #tpu.dot_dimension_numbers<[1], [0], [0], [1], [0, 0, 1, 1], [], []>} : vector<64x16xf32>, vector<16x128xf32>, vector<64x128xf32> -> vector<64x128xf32>
    %24 = arith.addf %21, %23 : vector<64x128xf32>
    %c0_16 = arith.constant 0 : index
    %c0_17 = arith.constant 0 : index
    %25 = vector.load %arg8[%c0_16, %c0_17] : memref<64x1xf32, #tpu.memory_space<vmem>>, vector<64x1xf32>
    %26 = vector.broadcast %25 : vector<64x1xf32> to vector<64x128xf32>
    %27 = arith.addf %24, %26 : vector<64x128xf32>
    %cst_18 = arith.constant 0.000000e+00 : f32
    %28 = vector.broadcast %cst_18 : f32 to vector<64x128xf32>
    %29 = arith.maximumf %27, %28 : vector<64x128xf32>
    %c0_19 = arith.constant 0 : index
    %c0_20 = arith.constant 0 : index
    %30 = vector.load %arg9[%c0_19, %c0_20] : memref<1x64xf32, #tpu.memory_space<vmem>>, vector<1x64xf32>
    %cst_21 = arith.constant dense<0.000000e+00> : vector<1x128xf32>
    %31 = tpu.matmul %30, %29, %cst_21 {dimension_numbers = #tpu.dot_dimension_numbers<[1], [0], [0], [1], [0, 0, 1, 1], [], []>} : vector<1x64xf32>, vector<64x128xf32>, vector<1x128xf32> -> vector<1x128xf32>
    %c0_22 = arith.constant 0 : index
    %c0_23 = arith.constant 0 : index
    %32 = vector.load %arg10[%c0_22, %c0_23] : memref<1x1xf32, #tpu.memory_space<vmem>>, vector<1x1xf32>
    %33 = vector.broadcast %32 : vector<1x1xf32> to vector<1x128xf32>
    %34 = arith.addf %31, %33 : vector<1x128xf32>
    %35 = arith.negf %34 : vector<1x128xf32>
    %36 = math.exp %35 : vector<1x128xf32>
    %cst_24 = arith.constant 1.000000e+00 : f32
    %37 = vector.broadcast %cst_24 : f32 to vector<1x128xf32>
    %38 = arith.addf %37, %36 : vector<1x128xf32>
    %39 = arith.divf %37, %38 : vector<1x128xf32>
    %c0_25 = arith.constant 0 : index
    %c0_26 = arith.constant 0 : index
    %40 = vector.load %arg11[%c0_25, %c0_26] : memref<1x128xf32, #tpu.memory_space<vmem>>, vector<1x128xf32>
    tpu.vector_store %arg11[%c0_25, %c0_26], %39 {strides = array<i32>} : memref<1x128xf32, #tpu.memory_space<vmem>>, vector<1x128xf32>,
    return
  }
  func.func @transform_0(%arg0: i32) -> (i32, i32) {
    %c0_i32 = arith.constant 0 : i32
    %c0_i32_0 = arith.constant 0 : i32
    return %c0_i32, %arg0 : i32, i32
  }
  func.func @transform_1(%arg0: i32) -> (i32, i32) {
    %c0_i32 = arith.constant 0 : i32
    %c0_i32_0 = arith.constant 0 : i32
    return %c0_i32, %arg0 : i32, i32
  }
  func.func @transform_2(%arg0: i32) -> (i32, i32) {
    %c0_i32 = arith.constant 0 : i32
    %c0_i32_0 = arith.constant 0 : i32
    return %c0_i32, %arg0 : i32, i32
  }
  func.func @transform_3(%arg0: i32) -> (i32, i32) {
    %c0_i32 = arith.constant 0 : i32
    %c0_i32_0 = arith.constant 0 : i32
    %c0_i32_1 = arith.constant 0 : i32
    return %c0_i32, %c0_i32_0 : i32, i32
  }
  func.func @transform_4(%arg0: i32) -> (i32, i32) {
    %c0_i32 = arith.constant 0 : i32
    %c0_i32_0 = arith.constant 0 : i32
    %c0_i32_1 = arith.constant 0 : i32
    return %c0_i32, %c0_i32_0 : i32, i32
  }
  func.func @transform_5(%arg0: i32) -> (i32, i32) {
    %c0_i32 = arith.constant 0 : i32
    %c0_i32_0 = arith.constant 0 : i32
    %c0_i32_1 = arith.constant 0 : i32
    return %c0_i32, %c0_i32_0 : i32, i32
  }
  func.func @transform_6(%arg0: i32) -> (i32, i32) {
    %c0_i32 = arith.constant 0 : i32
    %c0_i32_0 = arith.constant 0 : i32
    %c0_i32_1 = arith.constant 0 : i32
    return %c0_i32, %c0_i32_0 : i32, i32
  }
  func.func @transform_7(%arg0: i32) -> (i32, i32) {
    %c0_i32 = arith.constant 0 : i32
    %c0_i32_0 = arith.constant 0 : i32
    %c0_i32_1 = arith.constant 0 : i32
    return %c0_i32, %c0_i32_0 : i32, i32
  }
  func.func @transform_8(%arg0: i32) -> (i32, i32) {
    %c0_i32 = arith.constant 0 : i32
    %c0_i32_0 = arith.constant 0 : i32
    %c0_i32_1 = arith.constant 0 : i32
    return %c0_i32, %c0_i32_0 : i32, i32
  }
  func.func @transform_9(%arg0: i32) -> (i32, i32) {
    %c0_i32 = arith.constant 0 : i32
    %c0_i32_0 = arith.constant 0 : i32
    %c0_i32_1 = arith.constant 0 : i32
    return %c0_i32, %c0_i32_0 : i32, i32
  }
  func.func @transform_10(%arg0: i32) -> (i32, i32) {
    %c0_i32 = arith.constant 0 : i32
    %c0_i32_0 = arith.constant 0 : i32
    return %c0_i32, %arg0 : i32, i32
  }
}

</mosaic_0001>

<bundles_post_ra>
// kernel: neural_cdm_forward.1
= control target key start
LH: loop header
LB: loop body
LE: loop exit
PB: predicated region body
PF: predicated region fallthrough
CT: control target
= control target key end

     0   :  { %v39_v0 = vlaneseq  ;;  %vm159_vm0 = vcmask 195584   ;;  %vm75_vm1 = vcmask 261120   ;;  %v847_v9 = vmov 1.0   ;;  %s1045_s0 = inlined_call_operand.vmem [shape: s32[1,128], index: 0, kind: input, shape index: {}]   ;;  %s1046_s1 = inlined_call_operand.vmem [shape: s32[1,128], index: 1, kind: input, shape index: {}]   ;;  %s1047_s4 = inlined_call_operand.vmem [shape: f32[16,24], index: 4, kind: input, shape index: {}]   ;;  %s1048_s3 = inlined_call_operand.vmem [shape: f32[16,32], index: 3, kind: input, shape index: {}]   ;;  %s1049_s6 = inlined_call_operand.vmem [shape: f32[64,16], index: 6, kind: input, shape index: {}]   ;;  %s1050_s5 = inlined_call_operand.vmem [shape: f32[64,16], index: 5, kind: input, shape index: {}]   ;;  %s1051_s7 = inlined_call_operand.vmem [shape: f32[64,1], index: 7, kind: input, shape index: {}]   ;;  %s1052_s9 = inlined_call_operand.<no memory space> [shape: f32[1,1], index: 9, kind: input, shape index: {}]   ;;  %s1053_s2 = inlined_call_operand.vmem [shape: bf16[16,128], index: 2, kind: input, shape index: {}]   ;;  %s1054_s8 = inlined_call_operand.vmem [shape: f32[1,64], index: 8, kind: input, shape index: {}]   ;;  %s1055_s10 = inlined_call_operand.vmem [shape: f32[1,128], index: 10, kind: output, shape index: {}]  }
   0x1   :  { %v157_v1 = vld [vmem:[%s1047_s4] sm:$0xff]  ;;  %v158_v10 = vld [vmem:[%s1047_s4 + $0x8] sm:$0xff]  ;;  %vm265_vm9 = vcmask 130048   ;;  %v848_v14 = vmov 0   ;;  %v531_v15 = vld [vmem:[%s1051_s7 + $0x38] sm:$0xff]  ;;  %v15_v17 = vstv %s1052_s9  ;;  %v849_v50 = vmov 0.0  }
   0x2   :  { %v909_v2 = vshrl.u32 %v39_v0, 7  ;;  %783 = vmatprep.mubr.msk.f32.mxu1 %vm159_vm0, %v157_v1  ;;  %v73_v3 = vld [vmem:[%s1048_s3] sm:$0xff]  ;;  %v74_v11 = vld [vmem:[%s1048_s3 + $0x8] sm:$0xff]  ;;  %841 = vset.pattern.permute.xlu0 %v848_v14  ;;  %16 = vst [vmem:[#allocation2] sm:$0x1] %v15_v17  ;;  %v530_v18 = vld [vmem:[%s1051_s7 + $0x30] sm:$0xff] }
   0x3   :  { %v684_v4 = vld [vmem:[%s1045_s0] ss:$0 sm:$0xff]  ;;  %774 = vmatprep.mubr.msk.f32.mxu0 %vm75_vm1, %v73_v3  ;;  %842 = vset.pattern.permute.xlu1 %v848_v14  ;;  %v529_v16 = vld [vmem:[%s1051_s7 + $0x28] sm:$0xff]  ;;  %v527_v20 = vld [vmem:[%s1051_s7 + $0x18] sm:$0xff]  ;;  %vm850_vm10 = vmmov 0   ;;  %vm599_vm11 = vcmask 523264  }
   0x4   :  { %v689_v5 = vld [vmem:[%s1046_s1] ss:$0 sm:$0xff]  ;;  %v43_v6 = vadd.s32 24, %v909_v2  ;;  %v42_v7 = vadd.s32 16, %v909_v2  ;;  %v41_v8 = vadd.s32 8, %v909_v2  ;;  %vm48_vm8 = vcmp.eq.s32.totalorder %v909_v2, %v684_v4  ;;  %569 = vperm.xlu0 %841, %v531_v15   ;;  %559 = vperm.xlu1 %842, %v529_v16   ;;  %v526_v21 = vld [vmem:[%s1051_s7 + $0x10] sm:$0xff] }
   0x5   :  { %vm64_vm7 = vcmp.eq.s32.totalorder %v909_v2, %v689_v5  ;;  %v257_v12 = vld [vmem:[%s1049_s6] sm:$0xff]  ;;  %v525_v22 = vld [vmem:[%s1051_s7 + $0x8] sm:$0xff]  ;;  %v259_v37 = vld [vmem:[%s1049_s6 + $0x10] sm:$0xff] }
   0x6   :  { %vm51_vm2 = vcmp.eq.s32.totalorder %v43_v6, %v684_v4  ;;  %vm66_vm3 = vcmp.eq.s32.totalorder %v42_v7, %v689_v5  ;;  %vm50_vm4 = vcmp.eq.s32.totalorder %v42_v7, %v684_v4  ;;  %vm65_vm5 = vcmp.eq.s32.totalorder %v41_v8, %v689_v5  ;;  %v249_v13 = vld [vmem:[%s1050_s5] sm:$0xff]  ;;  %v258_v35 = vld [vmem:[%s1049_s6 + $0x8] sm:$0xff]  ;;  %v251_v39 = vld [vmem:[%s1050_s5 + $0x10] sm:$0xff] }
   0x7   :  { %766 = vmatprep.subr.msk.mxu0 %vm51_vm2, %v847_v9  ;;  %777 = vmatprep.subr.msk.mxu1 %vm66_vm3, %v847_v9  ;;  %vm49_vm6 = vcmp.eq.s32.totalorder %v41_v8, %v684_v4  ;;  %v528_v19 = vld [vmem:[%s1051_s7 + $0x20] sm:$0xff]  ;;  %v250_v38 = vld [vmem:[%s1050_s5 + $0x8] sm:$0xff]  ;;  %v260_v40 = vld [vmem:[%s1049_s6 + $0x18] sm:$0xff] }
   0x8   :  { %767 = vmatpush3.msk.msra.mxu0 %vm51_vm2, %v847_v9  ;;  %778 = vmatpush3.msk.msra.mxu1 %vm66_vm3, %v847_v9  ;;  %v524_v23 = vld [vmem:[%s1051_s7] sm:$0xff]  ;;  %v252_v42 = vld [vmem:[%s1050_s5 + $0x18] sm:$0xff]  ;;  %v262_v44 = vld [vmem:[%s1049_s6 + $0x28] sm:$0xff] }
   0x9   :  { %768 = vmatprep.subr.msk.mxu0 %vm50_vm4, %v847_v9  ;;  %779 = vmatprep.subr.msk.mxu1 %vm65_vm5, %v847_v9  ;;  %v589_v24 = vld [vmem:[#allocation2] sm:$0x1]  ;;  %v263_v45 = vld [vmem:[%s1049_s6 + $0x30] sm:$0xff]  ;;  %v254_v46 = vld [vmem:[%s1050_s5 + $0x28] sm:$0xff] }
   0xa   :  { %769 = vmatpush3.msk.msra.mxu0 %vm50_vm4, %v847_v9  ;;  %780 = vmatpush3.msk.msra.mxu1 %vm65_vm5, %v847_v9  ;;  %v723_v25 = vld [vmem:[%s1053_s2] sm:$0xff]   ;;  %v255_v47 = vld [vmem:[%s1050_s5 + $0x30] sm:$0xff]  ;;  %v264_v48 = vld [vmem:[%s1049_s6 + $0x38] sm:$0xff] }
   0xb   :  { %770 = vmatprep.subr.msk.mxu0 %vm49_vm6, %v847_v9  ;;  %781 = vmatprep.subr.msk.mxu1 %vm64_vm7, %v847_v9  ;;  %v725_v26 = vunpack.c.h.bf16 %v723_v25  ;;  %v724_v27 = vunpack.c.l.bf16 %v723_v25  ;;  %v261_v41 = vld [vmem:[%s1049_s6 + $0x20] sm:$0xff]  ;;  %v256_v49 = vld [vmem:[%s1050_s5 + $0x38] sm:$0xff] }
   0xc   :  { %771 = vmatpush3.msk.msra.mxu0 %vm49_vm6, %v847_v9  ;;  %782 = vmatpush3.msk.msra.mxu1 %vm64_vm7, %v847_v9  ;;  %v253_v43 = vld [vmem:[%s1050_s5 + $0x20] sm:$0xff] }
   0xd   :  { %772 = vmatprep.subr.msk.mxu0 %vm48_vm8, %v847_v9  ;;  %784 = vmatmul.mubr.msk.f32.vlgmr.msra.gmra.mxu1 %vm159_vm0, %v158_v10 }
   0xe   :  { %773 = vmatpush3.msk.msra.mxu0 %vm48_vm8, %v847_v9  ;;  %790 = vmatprep.mubr.msk.f32.mxu1 %vm265_vm9, %v257_v12 }
   0xf   :  { %775 = vmatmul.mubr.msk.f32.vlgmr.msra.gmra.mxu0 %vm75_vm1, %v74_v11  ;;  %564 = vperm.xlu0 %841, %v530_v18  }
  0x10   :  { %806 = vmatprep.mubr.msk.f32.mxu0 %vm265_vm9, %v249_v13  ;;  %554 = vperm.xlu1 %842, %v528_v19  }
  0x13   :  { %549 = vperm.xlu0 %841, %v527_v20  }
  0x14   :  { %544 = vperm.xlu1 %842, %v526_v21  }
  0x17   :  { %539 = vperm.xlu0 %841, %v525_v22  }
  0x18   :  { %534 = vperm.xlu1 %842, %v524_v23  }
  0x1b   :  { %592 = vperm.xlu0 %841, %v589_v24  }
  0x7f   :  { %v570_v56 = vpop.permute.xlu0 %569  ;;  %v560_v59 = vpop.permute.xlu1 %559 }
  0x8a   :  { %v565_v0 = vpop.permute.xlu0 %564 }
  0x8b   :  { %v555_v4 = vpop.permute.xlu1 %554 }
  0x8e   :  { %v550_v13 = vpop.permute.xlu0 %549 }
  0x8f   :  { %v545_v18 = vpop.permute.xlu1 %544 }
  0x92   :  { %v540_v25 = vpop.permute.xlu0 %539 }
  0xcd   :  { %v785_v28 = vpop.f32.mrf.mxu1 }
  0xce   :  { %v248_v29 = vmul.f32 %v785_v28, %v725_v26 }
  0xcf   :  { %v776_v30 = vpop.f32.mrf.mxu0  ;;  %v232_v31 = vpop.f32.mrf.mxu1 }
  0xd0   :  { %v246_v32 = vmul.f32 %v776_v30, %v725_v26  ;;  %v247_v33 = vmul.f32 %v724_v27, %v232_v31  ;;  %786 = vmatprep.subr.mxu1 %v248_v29 }
  0xd1   :  { %v148_v34 = vpop.f32.mrf.mxu0  ;;  %787 = vmatpush3.msra.mxu1 %v248_v29  ;;  %v535_v29 = vpop.permute.xlu1 %534 }
  0xd2   :  { %v245_v36 = vmul.f32 %v724_v27, %v148_v34  ;;  %788 = vmatprep.subr.mxu1 %v247_v33  ;;  %802 = vmatprep.subr.mxu0 %v246_v32 }
  0xd3   :  { %789 = vmatpush3.msra.mxu1 %v247_v33  ;;  %803 = vmatpush3.msra.mxu0 %v246_v32 }
  0xd4   :  { %791 = vmatmul.mubr.msk.f32.vlgmr.msra.gmra.mxu1 %vm265_vm9, %v258_v35  ;;  %804 = vmatprep.subr.mxu0 %v245_v36 }
  0xd5   :  { %805 = vmatpush3.msra.mxu0 %v245_v36  ;;  %793 = vmatprep.mubr.msk.f32.mxu1 %vm265_vm9, %v259_v37  ;;  %v588_v36 = vld [vmem:[%s1054_s8] sm:$0x1]  ;;  %v597_v37 = vsub.s32 0, %v909_v2 }
  0xd6   :  { %807 = vmatmul.mubr.msk.f32.vlgmr.msra.gmra.mxu0 %vm265_vm9, %v250_v38  ;;  %818 = vmatprep.subr.mxu1 %v849_v50  ;;  %v593_v38 = vpop.permute.xlu0 %592 }
  0xd7   :  { %809 = vmatprep.mubr.msk.f32.mxu0 %vm265_vm9, %v251_v39  ;;  %v598_v39 = vrot.slane %v593_v38, %v597_v37 }
  0xd8   :  { %794 = vmatmul.mubr.msk.f32.gmra.mxu1 %vm265_vm9, %v260_v40 }
  0xd9   :  { %796 = vmatprep.mubr.msk.f32.mxu1 %vm265_vm9, %v261_v41 }
  0xda   :  { %810 = vmatmul.mubr.msk.f32.gmra.mxu0 %vm265_vm9, %v252_v42 }
  0xdb   :  { %812 = vmatprep.mubr.msk.f32.mxu0 %vm265_vm9, %v253_v43 }
  0xdc   :  { %797 = vmatmul.mubr.msk.f32.gmra.mxu1 %vm265_vm9, %v262_v44 }
  0xdd   :  { %799 = vmatprep.mubr.msk.f32.mxu1 %vm265_vm9, %v263_v45 }
  0xde   :  { %813 = vmatmul.mubr.msk.f32.gmra.mxu0 %vm265_vm9, %v254_v46 }
  0xdf   :  { %815 = vmatprep.mubr.msk.f32.mxu0 %vm265_vm9, %v255_v47 }
  0xe0   :  { %800 = vmatmul.mubr.msk.f32.gmra.mxu1 %vm265_vm9, %v264_v48 }
  0xe1   :  { %834 = vmatprep.mubr.msk.f32.mxu1 %vm850_vm10, %v849_v50 }
  0xe2   :  { %816 = vmatmul.mubr.msk.f32.gmra.mxu0 %vm265_vm9, %v256_v49 }
 0x194   :  { %v792_v51 = vpop.f32.mrf.mxu1 }
 0x196   :  { %v356_v52 = vpop.f32.mrf.mxu1  ;;  %v808_v53 = vpop.f32.mrf.mxu0 }
 0x197   :  { %v491_v22 = vadd.f32 %v808_v53, %v792_v51 }
 0x198   :  { %v795_v54 = vpop.f32.mrf.mxu1  ;;  %v485_v55 = vpop.f32.mrf.mxu0 }
 0x199   :  { %v486_v26 = vadd.f32 %v485_v55, %v356_v52  ;;  %v573_v30 = vadd.f32 %v540_v25, %v491_v22 }
 0x19a   :  { %v366_v57 = vpop.f32.mrf.mxu1  ;;  %v811_v58 = vpop.f32.mrf.mxu0 }
 0x19b   :  { %v501_v14 = vadd.f32 %v811_v58, %v795_v54  ;;  %v572_v32 = vadd.f32 %v535_v29, %v486_v26  ;;  %v581_v34 = vmax.f32 %v573_v30, 0.0 }
 0x19c   :  { %v798_v60 = vpop.f32.mrf.mxu1  ;;  %v495_v61 = vpop.f32.mrf.mxu0 }
 0x19d   :  { %v496_v19 = vadd.f32 %v495_v61, %v366_v57  ;;  %v575_v23 = vadd.f32 %v550_v13, %v501_v14  ;;  %v580_v35 = vmax.f32 %v572_v32, 0.0 }
 0x19e   :  { %v376_v62 = vpop.f32.mrf.mxu1  ;;  %v814_v63 = vpop.f32.mrf.mxu0 }
 0x19f   :  { %v511_v6 = vadd.f32 %v814_v63, %v798_v60  ;;  %v574_v27 = vadd.f32 %v545_v18, %v496_v19  ;;  %v583_v31 = vmax.f32 %v575_v23, 0.0 }
 0x1a0   :  { %v801_v1 = vpop.f32.mrf.mxu1  ;;  %v505_v3 = vpop.f32.mrf.mxu0 }
 0x1a1   :  { %v506_v10 = vadd.f32 %v505_v3, %v376_v62  ;;  %v577_v15 = vadd.f32 %v560_v59, %v511_v6  ;;  %v582_v33 = vmax.f32 %v574_v27, 0.0 }
 0x1a2   :  { %v817_v5 = vpop.f32.mrf.mxu0  ;;  %v386_v8 = vpop.f32.mrf.mxu1 }
 0x1a3   :  { %v521_v7 = vadd.f32 %v817_v5, %v801_v1  ;;  %v576_v20 = vadd.f32 %v555_v4, %v506_v10  ;;  %v585_v24 = vmax.f32 %v577_v15, 0.0 }
 0x1a4   :  { %v515_v9 = vpop.f32.mrf.mxu0 }
 0x1a5   :  { %v579_v11 = vadd.f32 %v570_v56, %v521_v7  ;;  %v516_v12 = vadd.f32 %v515_v9, %v386_v8  ;;  %v584_v28 = vmax.f32 %v576_v20, 0.0 }
 0x1a7   :  { %v587_v16 = vmax.f32 %v579_v11, 0.0  ;;  %v578_v17 = vadd.f32 %v565_v0, %v516_v12 }
 0x1a9   :  { %v586_v21 = vmax.f32 %v578_v17, 0.0  ;;  %819 = vmatpush3.msra.mxu1 %v587_v16 }
 0x1aa   :  { %820 = vmatprep.subr.mxu1 %v849_v50 }
 0x1ab   :  { %821 = vmatpush3.msra.mxu1 %v586_v21 }
 0x1ac   :  { %822 = vmatprep.subr.mxu1 %v849_v50 }
 0x1ad   :  { %823 = vmatpush3.msra.mxu1 %v585_v24 }
 0x1ae   :  { %824 = vmatprep.subr.mxu1 %v849_v50 }
 0x1af   :  { %825 = vmatpush3.msra.mxu1 %v584_v28 }
 0x1b0   :  { %826 = vmatprep.subr.mxu1 %v849_v50 }
 0x1b1   :  { %827 = vmatpush3.msra.mxu1 %v583_v31 }
 0x1b2   :  { %828 = vmatprep.subr.mxu1 %v849_v50 }
 0x1b3   :  { %829 = vmatpush3.msra.mxu1 %v582_v33 }
 0x1b4   :  { %830 = vmatprep.subr.mxu1 %v849_v50 }
 0x1b5   :  { %831 = vmatpush3.msra.mxu1 %v581_v34 }
 0x1b6   :  { %832 = vmatprep.subr.mxu1 %v849_v50 }
 0x1b7   :  { %833 = vmatpush3.msra.mxu1 %v580_v35 }
 0x1b8   :  { %835 = vmatmul.mubr.msk.f32.vlgmr.msra.gmra.mxu1 %vm599_vm11, %v588_v36 }
 0x278   :  { %v669_v40 = vpop.f32.mrf.mxu1 }
 0x279   :  { %v670_v41 = vadd.f32 %v669_v40, %v598_v39 }
 0x27a   :  { %v836_v42 = vpop.f32.mrf.mxu1 }
 0x27b   :  { %v721_v43 = vmul.f32 -1.442695, %v670_v41 }
 0x27d   :  { %843 = vpow2.f32 %v721_v43 }
 0x28a   :  { %v844_v44 = vpop.eup %843 }
 0x28b   :  { %v676_v45 = vadd.f32 1.0, %v844_v44 }
 0x28d   :  { %845 = vrcp.f32 %v676_v45 }
 0x29a   :  { %v846_v46 = vpop.eup %845 }
 0x29b   :  { %679 = vst [vmem:[%s1055_s10] sm:$0x1] %v846_v46 }

</bundles_post_ra>
